<compile_context>
chip_gen: v7x
topology: tpu7x:2x2x1
jax: 0.10.0
libtpu: 0.0.40
codegen_flags: <defaults>
</compile_context>

<pallas_src>
import numpy as np
import jax
import jax.numpy as jnp
from jax import lax
from jax.experimental import pallas as pl
from jax.experimental.pallas import tpu as pltpu

N_QUBITS = 4
N_LAYERS = 2
DIM = 2 ** N_QUBITS                  # 16

STATE_DIM = 32
N_ACTIONS = 4
NUM_QUANTILES = 8
HIDDEN = 64
OUT_DIM = NUM_QUANTILES * N_ACTIONS  # 32 (== 2 * DIM for these constants)

# ---- single packed constant-blob layout (rows x 64 lanes, f32) ---------------
COLS32 = 2 * DIM                     # 32
BLOB_COLS = 64
ROW_W1 = 0                           # W1                rows   0:32, lanes 0:64
ROW_B1 = STATE_DIM                   # b1                row      32, lanes 0:64
ROW_UMAT = 40                        # fused entangler U rows  40:72, lanes 0:32
ROW_ZW3 = ROW_UMAT + COLS32          # (zsigns@W3) x2    rows  72:104, lanes 0:32
ROW_W2 = ROW_ZW3 + COLS32            # 0.5*W2            rows 104:168, lanes 0:4
ROW_B2 = ROW_W2 + HIDDEN             # 0.5*b2            row     168, lanes 0:4
ROW_B3 = ROW_B2 + 1                  # b3                row     169, lanes 0:32
ROW_PH = ROW_B3 + 1                  # (-i)^popcount     row     170, lanes 0:32
ROW_MASK = ROW_PH + 1                # bit masks (4 rows)rows 171:175, lanes 0:32
BLOB_ROWS = 176                      # 176 x 64 x 4B = 44 KiB


# ------------------------------------------------------------------------------
# Constant circuit matrices (wire 0 = most-significant bit, PennyLane default)
# ------------------------------------------------------------------------------
def _pauli_x_full(wire, n=N_QUBITS):
    X = np.array([[0.0, 1.0], [1.0, 0.0]], dtype=np.float64)
    I = np.eye(2, dtype=np.float64)
    M = np.array([[1.0]], dtype=np.float64)
    for i in range(n):
        M = np.kron(M, X if i == wire else I)
    return M  # symmetric


def _cnot_full(control, target, n=N_QUBITS):
    d = 2 ** n
    M = np.zeros((d, d), dtype=np.float64)
    for k in range(d):
        if (k >> (n - 1 - control)) & 1:
            j = k ^ (1 << (n - 1 - target))
        else:
            j = k
        M[j, k] = 1.0  # column-vector convention: new = M @ old
    return M


def _build_constants():
    xmats = np.stack([_pauli_x_full(w) for w in range(N_QUBITS)], axis=0)  # (4,16,16)
    # CNOT ring: CNOT(0,1), CNOT(1,2), CNOT(2,3), CNOT(3,0) applied in order
    ring = np.eye(DIM, dtype=np.float64)
    for w in range(N_QUBITS):
        ring = _cnot_full(w, (w + 1) % N_QUBITS) @ ring
    # Z-sign matrix: zsigns[k, w] = <k| Z_w |k>
    zsigns = np.zeros((DIM, N_QUBITS), dtype=np.float64)
    for k in range(DIM):
        for w in range(N_QUBITS):
            zsigns[k, w] = 1.0 - 2.0 * ((k >> (N_QUBITS - 1 - w)) & 1)
    return xmats, ring, zsigns


# ------------------------------------------------------------------------------
# Host-side constant folding of all weight-only operands into ONE packed blob
# ------------------------------------------------------------------------------
def pack_inputs(params, xmats_np, ring_np, zsigns_np):
    W1 = np.asarray(params["W1"], np.float64)
    b1 = np.asarray(params["b1"], np.float64).reshape(-1)
    W2 = np.asarray(params["W2"], np.float64)
    b2 = np.asarray(params["b2"], np.float64).reshape(-1)
    W3 = np.asarray(params["W3"], np.float64)
    b3 = np.asarray(params["b3"], np.float64).reshape(-1)
    qp = np.asarray(params["qparams"], np.float64)

    blob = np.zeros((BLOB_ROWS, BLOB_COLS), np.float64)

    # --- fc1 ------------------------------------------------------------------
    blob[ROW_W1:ROW_W1 + STATE_DIM, :] = W1
    blob[ROW_B1, :] = b1

    # --- fc2 with the 0.5 angle scale folded in (relu(0.5x) = 0.5 relu(x)) -----
    blob[ROW_W2:ROW_W2 + HIDDEN, 0:N_QUBITS] = 0.5 * W2
    blob[ROW_B2, 0:N_QUBITS] = 0.5 * b2

    # --- fused BasicEntanglerLayers unitary (depends only on weights) ----------
    U = np.eye(DIM, dtype=np.complex128)
    for l in range(N_LAYERS):
        for w in range(N_QUBITS):
            rx = (np.cos(qp[l, w] / 2) * np.eye(DIM)
                  - 1j * np.sin(qp[l, w] / 2) * xmats_np[w])
            U = rx @ U
        U = ring_np @ U
    Ur, Ui = U.real, U.imag
    # row-vector convention: [Re|Im]_out = [Re|Im]_in @ umat
    umat = np.zeros((2 * DIM, 2 * DIM), np.float64)
    umat[0:DIM, 0:DIM] = Ur.T
    umat[0:DIM, DIM:2 * DIM] = Ui.T
    umat[DIM:2 * DIM, 0:DIM] = -Ui.T
    umat[DIM:2 * DIM, DIM:2 * DIM] = Ur.T
    blob[ROW_UMAT:ROW_UMAT + 2 * DIM, 0:2 * DIM] = umat

    # --- PauliZ measurement + fc3 fold:  q = |psi|^2 @ (zsigns @ W3) + b3 ------
    ZW3 = zsigns_np @ W3                               # (16, 32)
    blob[ROW_ZW3:ROW_ZW3 + 2 * DIM, 0:OUT_DIM] = np.vstack([ZW3, ZW3])
    blob[ROW_B3, 0:OUT_DIM] = b3

    # --- (-i)^popcount(k) embedding phase, Re half | Im half -------------------
    re_cycle = (1.0, 0.0, -1.0, 0.0)
    im_cycle = (0.0, -1.0, 0.0, 1.0)
    for k in range(DIM):
        pc = bin(k).count("1") % 4
        blob[ROW_PH, k] = re_cycle[pc]
        blob[ROW_PH, DIM + k] = im_cycle[pc]

    # --- bit-mask rows: mask_w[lane] = bit_w(lane mod 16) -----------------------
    for w in range(N_QUBITS):
        for lane in range(2 * DIM):
            k = lane & (DIM - 1)
            blob[ROW_MASK + w, lane] = float((k >> (N_QUBITS - 1 - w)) & 1)

    return jnp.asarray(blob, jnp.float32)


# ------------------------------------------------------------------------------
# Pallas kernel: the entire forward pass for one state
# ------------------------------------------------------------------------------
def qrdqn_kernel(state_ref, blob_ref, out_ref):
    f32 = jnp.float32
    prec = lax.Precision.HIGHEST  # deterministic f32 MXU behaviour on all gens

    # packed constants (static slices of the single VMEM blob)
    w1 = blob_ref[ROW_W1:ROW_W1 + STATE_DIM, :]              # (32, 64)
    b1 = blob_ref[ROW_B1:ROW_B1 + 1, :]                      # (1, 64)
    w2p = blob_ref[ROW_W2:ROW_W2 + HIDDEN, 0:COLS32]         # (64, 32), lanes 0:4 = 0.5*W2
    b2p = blob_ref[ROW_B2:ROW_B2 + 1, 0:COLS32]              # (1, 32)   0.5*b2
    umat = blob_ref[ROW_UMAT:ROW_UMAT + 2 * DIM, 0:COLS32]   # (32, 32)
    zw3 = blob_ref[ROW_ZW3:ROW_ZW3 + 2 * DIM, 0:COLS32]      # (32, 32)
    b3 = blob_ref[ROW_B3:ROW_B3 + 1, 0:COLS32]               # (1, 32)
    ph32 = blob_ref[ROW_PH:ROW_PH + 1, 0:COLS32]             # (1, 32)

    # fc1 + relu : (1, 32) @ (32, 64)
    h = jnp.dot(state_ref[...], w1, preferred_element_type=f32, precision=prec) + b1
    h = jnp.maximum(h, 0.0)

    # fc2 + relu with the 0.5 scale already folded host-side:
    # lanes 0:4 hold theta/2; other lanes are exactly zero (cos=1/sin=0, never read).
    ang_half = jnp.dot(h, w2p, preferred_element_type=f32, precision=prec) + b2p
    ang_half = jnp.maximum(ang_half, 0.0)

    c = jnp.cos(ang_half)      # EUP
    s = jnp.sin(ang_half)

    # AngleEmbedding (RX on each wire) of |0..0> is a product state:
    #   psi[k] = (-i)^popcount(k) * prod_w (cos(a_w/2) if bit_w(k)=0 else sin(a_w/2))
    # Build [Re(psi) | Im(psi)] as one (1, 32) row using host-packed {0,1} masks:
    #   factor_w = c_w + mask_w * (s_w - c_w)         (pure VPU, no integer ops)
    prod = jnp.ones((1, 2 * DIM), f32)
    for w in range(N_QUBITS):
        mask_w = blob_ref[ROW_MASK + w:ROW_MASK + w + 1, 0:COLS32]  # (1, 32)
        c_w = c[:, w:w + 1]
        s_w = s[:, w:w + 1]
        prod = prod * (c_w + mask_w * (s_w - c_w))
    v = prod * ph32                                              # (1, 32) = [Re | Im]

    # BasicEntanglerLayers (weight-only) folded into one real 32x32 matrix
    v = jnp.dot(v, umat, preferred_element_type=f32, precision=prec)

    # PauliZ expectations + fc3 folded: q = |psi|^2 @ (zsigns @ W3) + b3
    out_ref[...] = jnp.dot(v * v, zw3, preferred_element_type=f32, precision=prec) + b3


@jax.jit
def qrdqn_forward(state, blob):
    state2d = state.reshape(1, -1).astype(jnp.float32)
    q_flat = pl.pallas_call(
        qrdqn_kernel,
        out_shape=jax.ShapeDtypeStruct((1, OUT_DIM), jnp.float32),
        in_specs=[pl.BlockSpec(memory_space=pltpu.MemorySpace.VMEM)] * 2,
        out_specs=pl.BlockSpec(memory_space=pltpu.MemorySpace.VMEM),
    )(state2d, blob)
    # q_values.view(-1, n_actions, num_quantiles)
    return q_flat.reshape(-1, N_ACTIONS, NUM_QUANTILES)


# ------------------------------------------------------------------------------
# Pure-numpy reference (complex statevector simulation) for verification
# ------------------------------------------------------------------------------
def reference_forward(state, params, xmats, ring, zsigns):
    W1 = np.asarray(params["W1"], np.float64); b1 = np.asarray(params["b1"], np.float64)
    W2 = np.asarray(params["W2"], np.float64); b2 = np.asarray(params["b2"], np.float64)
    W3 = np.asarray(params["W3"], np.float64); b3 = np.asarray(params["b3"], np.float64)
    qp = np.asarray(params["qparams"], np.float64)
    x = np.asarray(state, np.float64).reshape(1, -1)
    h = np.maximum(x @ W1 + b1, 0.0)
    ang = np.maximum(h @ W2 + b2, 0.0)[0]             # (4,)

    psi = np.zeros(DIM, dtype=np.complex128)
    psi[0] = 1.0

    def rx_full(theta, wire):
        return np.cos(theta / 2) * np.eye(DIM) - 1j * np.sin(theta / 2) * xmats[wire]

    for w in range(N_QUBITS):
        psi = rx_full(ang[w], w) @ psi
    for l in range(N_LAYERS):
        for w in range(N_QUBITS):
            psi = rx_full(qp[l, w], w) @ psi
        psi = ring @ psi

    probs = np.abs(psi) ** 2
    expz = probs @ zsigns                              # (4,)
    q = expz[None, :] @ W3 + b3                        # (1, Q*A)
    return q.reshape(-1, N_ACTIONS, NUM_QUANTILES)


# ------------------------------------------------------------------------------
# Main
# ------------------------------------------------------------------------------
if __name__ == "__main__":
    key = jax.random.PRNGKey(0)
    k_state, k_w1, k_b1, k_w2, k_b2, k_w3, k_b3, k_qp = jax.random.split(key, 8)

    xmats_np, ring_np, zsigns_np = _build_constants()

    def uinit(k, shape, fan_in):
        bound = 1.0 / np.sqrt(fan_in)
        return jax.random.uniform(k, shape, jnp.float32, -bound, bound)

    params = {
        "W1": uinit(k_w1, (STATE_DIM, HIDDEN), STATE_DIM),
        "b1": uinit(k_b1, (1, HIDDEN), STATE_DIM),
        "W2": uinit(k_w2, (HIDDEN, N_QUBITS), HIDDEN),
        "b2": uinit(k_b2, (1, N_QUBITS), HIDDEN),
        "W3": uinit(k_w3, (N_QUBITS, OUT_DIM), N_QUBITS),
        "b3": uinit(k_b3, (1, OUT_DIM), N_QUBITS),
        # TorchLayer's quantum weights: (n_layers, n_qubits), uniform [0, 2*pi)
        "qparams": jax.random.uniform(k_qp, (N_LAYERS, N_QUBITS), jnp.float32,
                                      0.0, 2.0 * np.pi),
    }

    blob = pack_inputs(params, xmats_np, ring_np, zsigns_np)
    state = jax.random.normal(k_state, (STATE_DIM,), jnp.float32)

    q_values = qrdqn_forward(state, blob)
    q_values = jax.block_until_ready(q_values)

    q_ref = reference_forward(np.asarray(state), params, xmats_np, ring_np, zsigns_np)
    np.testing.assert_allclose(np.asarray(q_values), q_ref, rtol=2e-4, atol=2e-5)

    assert q_values.shape == (1, N_ACTIONS, NUM_QUANTILES)
    print("KERNEL_OK")
</pallas_src>

<mosaic_0001>
module attributes {stable_mosaic.version = 11 : i64} {
  func.func @qrdqn_kernel(%arg0: memref<1x32xf32, #tpu.memory_space<vmem>>, %arg1: memref<176x64xf32, #tpu.memory_space<vmem>>, %arg2: memref<1x32xf32, #tpu.memory_space<vmem>>) attributes {dimension_semantics = [], scalar_prefetch = 0 : i64, scratch_operands = 0 : i64, tpu.core_type = #tpu.core_type<tc>} {
    %c0 = arith.constant 0 : index
    %c0_0 = arith.constant 0 : index
    %0 = vector.load %arg1[%c0, %c0_0] : memref<176x64xf32, #tpu.memory_space<vmem>>, vector<32x64xf32>
    %c32 = arith.constant 32 : index
    %c0_1 = arith.constant 0 : index
    %1 = vector.load %arg1[%c32, %c0_1] : memref<176x64xf32, #tpu.memory_space<vmem>>, vector<1x64xf32>
    %c104 = arith.constant 104 : index
    %c0_2 = arith.constant 0 : index
    %2 = vector.load %arg1[%c104, %c0_2] : memref<176x64xf32, #tpu.memory_space<vmem>>, vector<64x32xf32>
    %c168 = arith.constant 168 : index
    %c0_3 = arith.constant 0 : index
    %3 = vector.load %arg1[%c168, %c0_3] : memref<176x64xf32, #tpu.memory_space<vmem>>, vector<1x32xf32>
    %c40 = arith.constant 40 : index
    %c0_4 = arith.constant 0 : index
    %4 = vector.load %arg1[%c40, %c0_4] : memref<176x64xf32, #tpu.memory_space<vmem>>, vector<32x32xf32>
    %c72 = arith.constant 72 : index
    %c0_5 = arith.constant 0 : index
    %5 = vector.load %arg1[%c72, %c0_5] : memref<176x64xf32, #tpu.memory_space<vmem>>, vector<32x32xf32>
    %c169 = arith.constant 169 : index
    %c0_6 = arith.constant 0 : index
    %6 = vector.load %arg1[%c169, %c0_6] : memref<176x64xf32, #tpu.memory_space<vmem>>, vector<1x32xf32>
    %c170 = arith.constant 170 : index
    %c0_7 = arith.constant 0 : index
    %7 = vector.load %arg1[%c170, %c0_7] : memref<176x64xf32, #tpu.memory_space<vmem>>, vector<1x32xf32>
    %c0_8 = arith.constant 0 : index
    %c0_9 = arith.constant 0 : index
    %8 = vector.load %arg0[%c0_8, %c0_9] : memref<1x32xf32, #tpu.memory_space<vmem>>, vector<1x32xf32>
    %cst = arith.constant dense<0.000000e+00> : vector<1x64xf32>
    %9 = tpu.matmul %8, %0, %cst {dimension_numbers = #tpu.dot_dimension_numbers<[1], [0], [0], [1], [0, 0, 1, 1], [], []>, precision = #tpu.contract_precision<fp32>} : vector<1x32xf32>, vector<32x64xf32>, vector<1x64xf32> -> vector<1x64xf32>
    %10 = arith.addf %9, %1 : vector<1x64xf32>
    %cst_10 = arith.constant 0.000000e+00 : f32
    %11 = vector.broadcast %cst_10 : f32 to vector<1x64xf32>
    %12 = arith.maximumf %10, %11 : vector<1x64xf32>
    %cst_11 = arith.constant dense<0.000000e+00> : vector<1x32xf32>
    %13 = tpu.matmul %12, %2, %cst_11 {dimension_numbers = #tpu.dot_dimension_numbers<[1], [0], [0], [1], [0, 0, 1, 1], [], []>, precision = #tpu.contract_precision<fp32>} : vector<1x64xf32>, vector<64x32xf32>, vector<1x32xf32> -> vector<1x32xf32>
    %14 = arith.addf %13, %3 : vector<1x32xf32>
    %cst_12 = arith.constant 0.000000e+00 : f32
    %15 = vector.broadcast %cst_12 : f32 to vector<1x32xf32>
    %16 = arith.maximumf %14, %15 : vector<1x32xf32>
    %17 = math.cos %16 : vector<1x32xf32>
    %18 = math.sin %16 : vector<1x32xf32>
    %cst_13 = arith.constant 1.000000e+00 : f32
    %19 = vector.broadcast %cst_13 : f32 to vector<1x32xf32>
    %c171 = arith.constant 171 : index
    %c0_14 = arith.constant 0 : index
    %20 = vector.load %arg1[%c171, %c0_14] : memref<176x64xf32, #tpu.memory_space<vmem>>, vector<1x32xf32>
    %21 = vector.extract_strided_slice %17 {offsets = [0, 0], sizes = [1, 1], strides = [1, 1]} : vector<1x32xf32> to vector<1x1xf32>
    %22 = vector.extract_strided_slice %18 {offsets = [0, 0], sizes = [1, 1], strides = [1, 1]} : vector<1x32xf32> to vector<1x1xf32>
    %23 = arith.subf %22, %21 : vector<1x1xf32>
    %24 = vector.broadcast %23 : vector<1x1xf32> to vector<1x32xf32>
    %25 = arith.mulf %20, %24 : vector<1x32xf32>
    %26 = vector.broadcast %21 : vector<1x1xf32> to vector<1x32xf32>
    %27 = arith.addf %26, %25 : vector<1x32xf32>
    %28 = arith.mulf %19, %27 : vector<1x32xf32>
    %c172 = arith.constant 172 : index
    %c0_15 = arith.constant 0 : index
    %29 = vector.load %arg1[%c172, %c0_15] : memref<176x64xf32, #tpu.memory_space<vmem>>, vector<1x32xf32>
    %30 = vector.extract_strided_slice %17 {offsets = [0, 1], sizes = [1, 1], strides = [1, 1]} : vector<1x32xf32> to vector<1x1xf32>
    %31 = vector.extract_strided_slice %18 {offsets = [0, 1], sizes = [1, 1], strides = [1, 1]} : vector<1x32xf32> to vector<1x1xf32>
    %32 = arith.subf %31, %30 : vector<1x1xf32>
    %33 = vector.broadcast %32 : vector<1x1xf32> to vector<1x32xf32>
    %34 = arith.mulf %29, %33 : vector<1x32xf32>
    %35 = vector.broadcast %30 : vector<1x1xf32> to vector<1x32xf32>
    %36 = arith.addf %35, %34 : vector<1x32xf32>
    %37 = arith.mulf %28, %36 : vector<1x32xf32>
    %c173 = arith.constant 173 : index
    %c0_16 = arith.constant 0 : index
    %38 = vector.load %arg1[%c173, %c0_16] : memref<176x64xf32, #tpu.memory_space<vmem>>, vector<1x32xf32>
    %39 = vector.extract_strided_slice %17 {offsets = [0, 2], sizes = [1, 1], strides = [1, 1]} : vector<1x32xf32> to vector<1x1xf32>
    %40 = vector.extract_strided_slice %18 {offsets = [0, 2], sizes = [1, 1], strides = [1, 1]} : vector<1x32xf32> to vector<1x1xf32>
    %41 = arith.subf %40, %39 : vector<1x1xf32>
    %42 = vector.broadcast %41 : vector<1x1xf32> to vector<1x32xf32>
    %43 = arith.mulf %38, %42 : vector<1x32xf32>
    %44 = vector.broadcast %39 : vector<1x1xf32> to vector<1x32xf32>
    %45 = arith.addf %44, %43 : vector<1x32xf32>
    %46 = arith.mulf %37, %45 : vector<1x32xf32>
    %c174 = arith.constant 174 : index
    %c0_17 = arith.constant 0 : index
    %47 = vector.load %arg1[%c174, %c0_17] : memref<176x64xf32, #tpu.memory_space<vmem>>, vector<1x32xf32>
    %48 = vector.extract_strided_slice %17 {offsets = [0, 3], sizes = [1, 1], strides = [1, 1]} : vector<1x32xf32> to vector<1x1xf32>
    %49 = vector.extract_strided_slice %18 {offsets = [0, 3], sizes = [1, 1], strides = [1, 1]} : vector<1x32xf32> to vector<1x1xf32>
    %50 = arith.subf %49, %48 : vector<1x1xf32>
    %51 = vector.broadcast %50 : vector<1x1xf32> to vector<1x32xf32>
    %52 = arith.mulf %47, %51 : vector<1x32xf32>
    %53 = vector.broadcast %48 : vector<1x1xf32> to vector<1x32xf32>
    %54 = arith.addf %53, %52 : vector<1x32xf32>
    %55 = arith.mulf %46, %54 : vector<1x32xf32>
    %56 = arith.mulf %55, %7 : vector<1x32xf32>
    %cst_18 = arith.constant dense<0.000000e+00> : vector<1x32xf32>
    %57 = tpu.matmul %56, %4, %cst_18 {dimension_numbers = #tpu.dot_dimension_numbers<[1], [0], [0], [1], [0, 0, 1, 1], [], []>, precision = #tpu.contract_precision<fp32>} : vector<1x32xf32>, vector<32x32xf32>, vector<1x32xf32> -> vector<1x32xf32>
    %58 = arith.mulf %57, %57 : vector<1x32xf32>
    %cst_19 = arith.constant dense<0.000000e+00> : vector<1x32xf32>
    %59 = tpu.matmul %58, %5, %cst_19 {dimension_numbers = #tpu.dot_dimension_numbers<[1], [0], [0], [1], [0, 0, 1, 1], [], []>, precision = #tpu.contract_precision<fp32>} : vector<1x32xf32>, vector<32x32xf32>, vector<1x32xf32> -> vector<1x32xf32>
    %60 = arith.addf %59, %6 : vector<1x32xf32>
    %c0_20 = arith.constant 0 : index
    %c0_21 = arith.constant 0 : index
    %61 = vector.load %arg2[%c0_20, %c0_21] : memref<1x32xf32, #tpu.memory_space<vmem>>, vector<1x32xf32>
    tpu.vector_store %arg2[%c0_20, %c0_21], %60 {strides = array<i32>} : memref<1x32xf32, #tpu.memory_space<vmem>>, vector<1x32xf32>,
    return
  }
}

</mosaic_0001>

<bundles_post_ra>
// kernel: qrdqn_forward.1
= control target key start
LH: loop header
LB: loop body
LE: loop exit
PB: predicated region body
PF: predicated region fallthrough
CT: control target
= control target key end

     0   :  { %vm36_vm0 = vcmask 261120   ;;  %v3024_v0 = vmov 0.0|0.0   ;;  %vm3025_vm1 = vmmov 0   ;;  %v3026_v8 = vmov 0.0   ;;  %s3359_s1 = inlined_call_operand.vmem [shape: f32[176,64], index: 1, kind: input, shape index: {}]   ;;  %s3360_s0 = inlined_call_operand.vmem [shape: f32[1,32], index: 0, kind: input, shape index: {}]   ;;  %s3361_s2 = inlined_call_operand.vmem [shape: f32[1,32], index: 2, kind: output, shape index: {}]  }
   0x1   :  { %2773 = vmatprep.subr.bf16.mxu1 %v3024_v0  ;;  %2791 = vmatprep.subr.bf16.mxu0 %v3024_v0  ;;  %v11_v1 = vld [vmem:[%s3359_s1] sm:$0xff]  ;;  %v12_v2 = vld [vmem:[%s3359_s1 + $0x8] sm:$0xff]  ;;  %v13_v3 = vld [vmem:[%s3359_s1 + $0x10] sm:$0xff]  ;;  %vm526_vm2 = vcmask 523264  }
   0x2   :  { %v41_v4 = vand.u32 4294901760, %v11_v1  ;;  %v44_v5 = vand.u32 4294901760, %v12_v2  ;;  %v14_v6 = vld [vmem:[%s3359_s1 + $0x18] sm:$0xff]  ;;  %v47_v7 = vand.u32 4294901760, %v13_v3  ;;  %2469 = vmatprep.mubr.msk.f32.mxu1 %vm3025_vm1, %v3026_v8  ;;  %2502 = vmatprep.mubr.msk.f32.mxu0 %vm3025_vm1, %v3026_v8  ;;  %v35_v9 = vld [vmem:[%s3360_s0] sm:$0x1] }
   0x3   :  { %v50_v10 = vand.u32 4294901760, %v14_v6  ;;  %v38_v11 = vsel %vm36_vm0, %v35_v9, 0  ;;  %v16_v41 = vld [vmem:[%s3359_s1 + $0x68] sm:$0xff]  ;;  %v17_v42 = vld [vmem:[%s3359_s1 + $0x70] sm:$0xff]  ;;  %v18_v46 = vld [vmem:[%s3359_s1 + $0x78] sm:$0xff] }
   0x4   :  { %v2774_v12 = vpack.c.bf16 %v44_v5, %v41_v4  ;;  %v121_v13 = vsub.f32 %v11_v1, %v41_v4  ;;  %v128_v14 = vsub.f32 %v12_v2, %v44_v5  ;;  %v135_v15 = vsub.f32 %v13_v3, %v47_v7  ;;  %v19_v47 = vld [vmem:[%s3359_s1 + $0x80] sm:$0xff]  ;;  %v20_v51 = vld [vmem:[%s3359_s1 + $0x88] sm:$0xff]  ;;  %v21_v52 = vld [vmem:[%s3359_s1 + $0x90] sm:$0xff] }
   0x5   :  { %v142_v16 = vsub.f32 %v14_v6, %v50_v10  ;;  %v109_v17 = vand.u32 4294901760, %v38_v11  ;;  %v2777_v18 = vpack.c.bf16 %v50_v10, %v47_v7  ;;  %v531_v43 = vand.u32 4294901760, %v16_v41  ;;  %v22_v58 = vld [vmem:[%s3359_s1 + $0x98] sm:$0xff]  ;;  %v23_v59 = vld [vmem:[%s3359_s1 + $0xa0] sm:$0xff] }
   0x6   :  { %2775 = vmatpush3.bf16.msra.mxu1 %v2774_v12  ;;  %2793 = vmatpush3.bf16.msra.mxu0 %v2774_v12  ;;  %v122_v19 = vand.u32 4294901760, %v121_v13  ;;  %v129_v20 = vand.u32 4294901760, %v128_v14  ;;  %v136_v21 = vand.u32 4294901760, %v135_v15  ;;  %v2786_v39 = vpack.c.bf16 %v128_v14, %v121_v13 }
   0x7   :  { %2776 = vmatprep.subr.bf16.mxu1 %v3024_v0  ;;  %2794 = vmatprep.subr.bf16.mxu0 %v3024_v0  ;;  %v110_v22 = vsub.f32 %v38_v11, %v109_v17  ;;  %v143_v23 = vand.u32 4294901760, %v142_v16  ;;  %v2789_v40 = vpack.c.bf16 %v142_v16, %v135_v15  ;;  %v534_v44 = vand.u32 4294901760, %v17_v42 }
   0x8   :  { %v123_v24 = vsub.f32 %v121_v13, %v122_v19  ;;  %v130_v25 = vsub.f32 %v128_v14, %v129_v20  ;;  %v137_v26 = vsub.f32 %v135_v15, %v136_v21  ;;  %v2798_v31 = vpack.c.bf16 %v129_v20, %v122_v19 }
   0x9   :  { %v111_v27 = vand.u32 4294901760, %v110_v22  ;;  %v144_v28 = vsub.f32 %v142_v16, %v143_v23  ;;  %v2801_v37 = vpack.c.bf16 %v143_v23, %v136_v21  ;;  %v3104_v45 = vpack.c.bf16 %v534_v44, %v531_v43 }
   0xa   :  { %2778 = vmatpush3.bf16.msra.mxu1 %v2777_v18  ;;  %2796 = vmatpush3.bf16.msra.mxu0 %v2777_v18  ;;  %v124_v29 = vand.u32 4294901760, %v123_v24  ;;  %v131_v30 = vand.u32 4294901760, %v130_v25  ;;  %v138_v34 = vand.u32 4294901760, %v137_v26  ;;  %v537_v48 = vand.u32 4294901760, %v18_v46 }
   0xb   :  { %v112_v32 = vsub.f32 %v110_v22, %v111_v27  ;;  %2779 = vmatprep.subr.bf16.mxu1 %v3024_v0  ;;  %2797 = vmatprep.subr.bf16.mxu0 %v3024_v0  ;;  %v145_v35 = vand.u32 4294901760, %v144_v28  ;;  %v540_v49 = vand.u32 4294901760, %v19_v47  ;;  %v543_v53 = vand.u32 4294901760, %v20_v51 }
   0xc   :  { %v2780_v33 = vpack.c.bf16 %v131_v30, %v124_v29  ;;  %v546_v54 = vand.u32 4294901760, %v21_v52  ;;  %v3124_v55 = vsub.f32 %v16_v41, %v531_v43  ;;  %v3126_v56 = vsub.f32 %v17_v42, %v534_v44  ;;  %v15_v43 = vld [vmem:[%s3359_s1 + $0x20] sm:$0x1] }
   0xd   :  { %v113_v36 = vand.u32 4294901760, %v112_v32  ;;  %2503 = vmatmul.mubr.f32.vlgmr.msra.gmra.mrb[0].mxu0 %v111_v27  ;;  %v2783_v38 = vpack.c.bf16 %v145_v35, %v138_v34  ;;  %v3114_v50 = vpack.c.bf16 %v540_v49, %v537_v48  ;;  %v549_v60 = vand.u32 4294901760, %v22_v58 }
   0xe   :  { %2799 = vmatpush3.bf16.msra.mxu0 %v2798_v31  ;;  %2513 = vmatprep.mubr.msk.f32.mxu0 %vm3025_vm1, %v3026_v8  ;;  %v3128_v57 = vpack.c.bf16 %v546_v54, %v543_v53  ;;  %v552_v61 = vand.u32 4294901760, %v23_v59  ;;  %v616_v62 = vand.u32 4294901760, %v3124_v55  ;;  %v623_v63 = vand.u32 4294901760, %v3126_v56 }
   0xf   :  { %2470 = vmatmul.mubr.f32.vlgmr.msra.gmra.mrb[0].mxu1 %v113_v36  ;;  %2800 = vmatprep.subr.bf16.mxu0 %v3024_v0  ;;  %v3140_v1 = vsub.f32 %v18_v46, %v537_v48  ;;  %v3142_v2 = vsub.f32 %v19_v47, %v540_v49  ;;  %v3144_v3 = vsub.f32 %v20_v51, %v543_v53 }
  0x10   :  { %2781 = vmatpush3.bf16.msra.mxu1 %v2780_v33  ;;  %2480 = vmatprep.mubr.msk.f32.mxu1 %vm3025_vm1, %v3026_v8  ;;  %v3146_v4 = vsub.f32 %v21_v52, %v546_v54  ;;  %v3148_v5 = vpack.c.bf16 %v552_v61, %v549_v60  ;;  %v3150_v6 = vsub.f32 %v22_v58, %v549_v60  ;;  %v3027_v60 = vmov 0  }
  0x11   :  { %2782 = vmatprep.subr.bf16.mxu1 %v3024_v0  ;;  %v3152_v7 = vsub.f32 %v23_v59, %v552_v61  ;;  %v617_v9 = vsub.f32 %v3124_v55, %v616_v62  ;;  %v624_v10 = vsub.f32 %v3126_v56, %v623_v63  ;;  %v637_v13 = vand.u32 4294901760, %v3142_v2  ;;  %3012 = vset.pattern.permute.xlu1 %v3027_v60 }
  0x12   :  { %2802 = vmatpush3.bf16.msra.mxu0 %v2801_v37  ;;  %v644_v20 = vand.u32 4294901760, %v3144_v3  ;;  %v651_v21 = vand.u32 4294901760, %v3146_v4  ;;  %v658_v27 = vand.u32 4294901760, %v3150_v6  ;;  %v2834_v35 = vpack.c.bf16 %v3126_v56, %v3124_v55  ;;  %3014 = vset.pattern.permute.xlu0 %v3027_v60 }
  0x13   :  { %2803 = vmatprep.subr.bf16.mxu0 %v3024_v0  ;;  %v618_v11 = vand.u32 4294901760, %v617_v9  ;;  %v625_v14 = vand.u32 4294901760, %v624_v10  ;;  %v638_v16 = vsub.f32 %v3142_v2, %v637_v13  ;;  %v665_v28 = vand.u32 4294901760, %v3152_v7 }
  0x14   :  { %2784 = vmatpush3.bf16.msra.mxu1 %v2783_v38  ;;  %v645_v23 = vsub.f32 %v3144_v3, %v644_v20  ;;  %v652_v24 = vsub.f32 %v3146_v4, %v651_v21  ;;  %v659_v30 = vsub.f32 %v3150_v6, %v658_v27  ;;  %v2837_v36 = vpack.c.bf16 %v3142_v2, %v3140_v1 }
  0x15   :  { %2785 = vmatprep.subr.bf16.mxu1 %v3024_v0  ;;  %2514 = vmatmul.mubr.f32.vlgmr.msra.gmra.mrb[0].mxu0 %v109_v17  ;;  %v639_v19 = vand.u32 4294901760, %v638_v16  ;;  %v666_v31 = vsub.f32 %v3152_v7, %v665_v28  ;;  %v2840_v37 = vpack.c.bf16 %v3146_v4, %v3144_v3  ;;  %v2843_v38 = vpack.c.bf16 %v3152_v7, %v3150_v6 }
  0x16   :  { %2805 = vmatpush3.bf16.msra.mxu0 %v2774_v12  ;;  %2524 = vmatprep.mubr.msk.f32.mxu0 %vm3025_vm1, %v3026_v8  ;;  %v630_v12 = vand.u32 4294901760, %v3140_v1  ;;  %v646_v25 = vand.u32 4294901760, %v645_v23  ;;  %v653_v26 = vand.u32 4294901760, %v652_v24  ;;  %v660_v32 = vand.u32 4294901760, %v659_v30 }
  0x17   :  { %2481 = vmatmul.mubr.f32.vlgmr.msra.gmra.mrb[0].mxu1 %v109_v17  ;;  %2806 = vmatprep.subr.bf16.mxu0 %v3024_v0  ;;  %v667_v33 = vand.u32 4294901760, %v666_v31  ;;  %v2864_v41 = vpack.c.bf16 %v651_v21, %v644_v20  ;;  %v2867_v42 = vpack.c.bf16 %v665_v28, %v658_v27  ;;  %v3030_v16 = vmov 2131351028  }
  0x18   :  { %2787 = vmatpush3.bf16.msra.mxu1 %v2786_v39  ;;  %2491 = vmatprep.mubr.msk.f32.mxu1 %vm3025_vm1, %v3026_v8  ;;  %v631_v15 = vsub.f32 %v3140_v1, %v630_v12  ;;  %v2828_v29 = vpack.c.bf16 %v653_v26, %v646_v25  ;;  %v2858_v39 = vpack.c.bf16 %v623_v63, %v616_v62  ;;  %v3033_v25 = vmov 1326507024  }
  0x19   :  { %2788 = vmatprep.subr.bf16.mxu1 %v3024_v0  ;;  %v2831_v34 = vpack.c.bf16 %v667_v33, %v660_v32 }
  0x1a   :  { %2808 = vmatpush3.bf16.msra.mxu0 %v2777_v18  ;;  %v632_v18 = vand.u32 4294901760, %v631_v15 }
  0x1b   :  { %2881 = vmatprep.subr.bf16.mxu0 %v3024_v0 }
  0x1c   :  { %2790 = vmatpush3.bf16.msra.mxu1 %v2789_v40  ;;  %v2861_v40 = vpack.c.bf16 %v637_v13, %v630_v12  ;;  %v3029_v13 = vmov 2475754826  }
  0x1d   :  { %2525 = vmatmul.mubr.f32.vlgmr.msra.gmra.mrb[0].mxu0 %v109_v17  ;;  %2809 = vmatprep.subr.bf16.mxu1 %v3024_v0  ;;  %v2822_v17 = vpack.c.bf16 %v625_v14, %v618_v11  ;;  %v3028_v11 = vmov 683565275  }
  0x1e   :  { %2649 = vmatprep.mubr.msk.f32.mxu0 %vm3025_vm1, %v3026_v8 }
  0x1f   :  { %2492 = vmatmul.mubr.f32.vlgmr.msra.gmra.mrb[0].mxu1 %v110_v22  ;;  %v2825_v22 = vpack.c.bf16 %v639_v19, %v632_v18  ;;  %v3031_v19 = vmov 2102212464  }
  0x20   :  { %2543 = vmatprep.mubr.msk.f32.mxu1 %vm3025_vm1, %v3026_v8  ;;  %2811 = vmatpush3.bf16.msra.mxu1 %v3104_v45 }
  0x21   :  { %2812 = vmatprep.subr.bf16.mxu1 %v3024_v0 }
  0x24   :  { %2814 = vmatpush3.bf16.msra.mxu1 %v3114_v50 }
  0x25   :  { %2815 = vmatprep.subr.bf16.mxu1 %v3024_v0 }
  0x28   :  { %2817 = vmatpush3.bf16.msra.mxu1 %v3128_v57 }
  0x29   :  { %2818 = vmatprep.subr.bf16.mxu1 %v3024_v0 }
  0x2c   :  { %2820 = vmatpush3.bf16.msra.mxu1 %v3148_v5 }
  0x2d   :  { %2821 = vmatprep.subr.bf16.mxu1 %v3024_v0 }
  0xf0   :  { %v521_v44 = vpop.f32.mrb[0].mxu0 }
  0xf1   :  { %v2526_v46 = vpop.f32.mrb[1].mxu0 }
  0xf2   :  { %v286_v47 = vpop.f32.mrb[0].mxu1 }
  0xf3   :  { %v2953_v48 = vadd.f32 %v286_v47, %v15_v43  ;;  %v2493_v49 = vpop.f32.mrb[1].mxu1 }
  0xf5   :  { %v2954_v51 = vadd.f32 %v2953_v48, %v521_v44 }
  0xf7   :  { %v525_v52 = vmax.f32 %v2954_v51, 0.0 }
  0xf9   :  { %v528_v53 = vsel %vm526_vm2, %v525_v52, 0 }
  0xfa   :  { %v603_v54 = vand.u32 4294901760, %v528_v53 }
  0xfc   :  { %v604_v55 = vsub.f32 %v528_v53, %v603_v54 }
  0xfe   :  { %v605_v56 = vand.u32 4294901760, %v604_v55 }
 0x100   :  { %v606_v58 = vsub.f32 %v604_v55, %v605_v56 }
 0x102   :  { %v607_v59 = vand.u32 4294901760, %v606_v58 }
 0x104   :  { %2544 = vmatmul.mubr.f32.vlgmr.msra.gmra.mrb[2].mxu1 %v607_v59 }
 0x105   :  { %2823 = vmatpush3.bf16.msra.mxu1 %v2822_v17  ;;  %2562 = vmatprep.mubr.msk.f32.mxu1 %vm3025_vm1, %v3026_v8 }
 0x106   :  { %2824 = vmatprep.subr.bf16.mxu1 %v3024_v0 }
 0x109   :  { %2826 = vmatpush3.bf16.msra.mxu1 %v2825_v22  ;;  %v3032_v22 = vmov 920167782  }
 0x10a   :  { %2827 = vmatprep.subr.bf16.mxu1 %v3024_v0 }
 0x10d   :  { %2829 = vmatpush3.bf16.msra.mxu1 %v2828_v29 }
 0x10e   :  { %2830 = vmatprep.subr.bf16.mxu1 %v3024_v0 }
 0x111   :  { %2832 = vmatpush3.bf16.msra.mxu1 %v2831_v34 }
 0x112   :  { %2833 = vmatprep.subr.bf16.mxu1 %v3024_v0 }
 0x114   :  { %2563 = vmatmul.mubr.f32.vlgmr.msra.gmra.mrb[2].mxu1 %v603_v54 }
 0x115   :  { %2835 = vmatpush3.bf16.msra.mxu1 %v2834_v35  ;;  %2581 = vmatprep.mubr.msk.f32.mxu1 %vm3025_vm1, %v3026_v8 }
 0x116   :  { %2836 = vmatprep.subr.bf16.mxu1 %v3024_v0 }
 0x119   :  { %2838 = vmatpush3.bf16.msra.mxu1 %v2837_v36 }
 0x11a   :  { %2839 = vmatprep.subr.bf16.mxu1 %v3024_v0 }
 0x11d   :  { %2841 = vmatpush3.bf16.msra.mxu1 %v2840_v37 }
 0x11e   :  { %2842 = vmatprep.subr.bf16.mxu1 %v3024_v0 }
 0x121   :  { %2844 = vmatpush3.bf16.msra.mxu1 %v2843_v38 }
 0x122   :  { %2845 = vmatprep.subr.bf16.mxu1 %v3024_v0 }
 0x124   :  { %2582 = vmatmul.mubr.f32.vlgmr.msra.gmra.mrb[2].mxu1 %v604_v55 }
 0x125   :  { %2847 = vmatpush3.bf16.msra.mxu1 %v3104_v45  ;;  %2600 = vmatprep.mubr.msk.f32.mxu1 %vm3025_vm1, %v3026_v8 }
 0x126   :  { %2848 = vmatprep.subr.bf16.mxu1 %v3024_v0 }
 0x129   :  { %2850 = vmatpush3.bf16.msra.mxu1 %v3114_v50 }
 0x12a   :  { %2851 = vmatprep.subr.bf16.mxu1 %v3024_v0 }
 0x12d   :  { %2853 = vmatpush3.bf16.msra.mxu1 %v3128_v57 }
 0x12e   :  { %2854 = vmatprep.subr.bf16.mxu1 %v3024_v0 }
 0x131   :  { %2856 = vmatpush3.bf16.msra.mxu1 %v3148_v5 }
 0x132   :  { %2857 = vmatprep.subr.bf16.mxu1 %v3024_v0 }
 0x134   :  { %2601 = vmatmul.mubr.f32.vlgmr.msra.gmra.mrb[2].mxu1 %v605_v56 }
 0x135   :  { %2859 = vmatpush3.bf16.msra.mxu1 %v2858_v39  ;;  %2619 = vmatprep.mubr.msk.f32.mxu1 %vm3025_vm1, %v3026_v8 }
 0x136   :  { %2860 = vmatprep.subr.bf16.mxu1 %v3024_v0 }
 0x139   :  { %2862 = vmatpush3.bf16.msra.mxu1 %v2861_v40 }
 0x13a   :  { %2863 = vmatprep.subr.bf16.mxu1 %v3024_v0 }
 0x13d   :  { %2865 = vmatpush3.bf16.msra.mxu1 %v2864_v41 }
 0x13e   :  { %2866 = vmatprep.subr.bf16.mxu1 %v3024_v0 }
 0x141   :  { %2868 = vmatpush3.bf16.msra.mxu1 %v2867_v42 }
 0x142   :  { %2869 = vmatprep.subr.bf16.mxu1 %v3024_v0 }
 0x144   :  { %2620 = vmatmul.mubr.f32.vlgmr.msra.gmra.mrb[2].mxu1 %v603_v54 }
 0x145   :  { %2871 = vmatpush3.bf16.msra.mxu1 %v3104_v45  ;;  %2638 = vmatprep.mubr.msk.f32.mxu1 %vm3025_vm1, %v3026_v8  ;;  %v24_v45 = vld [vmem:[%s3359_s1 + $0xa8] sm:$0x1] }
 0x146   :  { %2872 = vmatprep.subr.bf16.mxu1 %v3024_v0 }
 0x149   :  { %2874 = vmatpush3.bf16.msra.mxu1 %v3114_v50 }
 0x14a   :  { %2875 = vmatprep.subr.bf16.mxu1 %v3024_v0 }
 0x14d   :  { %2877 = vmatpush3.bf16.msra.mxu1 %v3128_v57 }
 0x14e   :  { %2878 = vmatprep.subr.bf16.mxu1 %v3024_v0 }
 0x151   :  { %2880 = vmatpush3.bf16.msra.mxu1 %v3148_v5 }
 0x154   :  { %2639 = vmatmul.mubr.f32.vlgmr.msra.gmra.mrb[2].mxu1 %v603_v54 }
 0x227   :  { %v1063_v61 = vpop.f32.mrb[2].mxu1 }
 0x228   :  { %v2955_v62 = vadd.f32 %v1063_v61, %v24_v45  ;;  %v2640_v63 = vpop.f32.mrb[3].mxu1 }
 0x22a   :  { %v3221_v50 = vmax.f32 %v2955_v62, 0.0 }
 0x22c   :  { %v1071_v1 = vand.u32 2139095040, %v3221_v50  ;;  %v1068_v4 = vand.u32 2147483647, %v3221_v50  ;;  %vm1070_vm10 = vcmp.lt.s32.totalorder %v3221_v50, 0 }
 0x22e   :  { %v1072_v57 = vshrl.u32 %v1071_v1, 23  ;;  %v1075_v7 = vand.u32 8388607, %v1068_v4  ;;  %vm1069_vm11 = vcmp.le.f32.partialorder %v1068_v4, 0.7853982 }
 0x230   :  { %v2309_v2 = vadd.s32 4294967169, %v1072_v57  ;;  %v1076_v27 = vor.u32 8388608, %v1075_v7 }
 0x232   :  { %v1078_v3 = vadd.s32 1, %v2309_v2  ;;  %v1116_v41 = vshll.u32 %v1076_v27, 8 }
 0x234   :  { %vm1079_vm3 = vcmp.gt.s32.totalorder %v1078_v3, 0 }
 0x235   :  { %v1080_v5 = vsel %vm1079_vm3, %v1078_v3, 0 }
 0x236   :  { %v1082_v6 = vand.u32 31, %v1080_v5  ;;  %v1081_v10 = vshrl.u32 %v1080_v5, 5 }
 0x238   :  { %v1083_v9 = vsub.s32 32, %v1082_v6  ;;  %v1085_v12 = vshll.u32 %v3028_v11, %v1082_v6  ;;  %v1088_v14 = vshll.u32 %v3029_v13, %v1082_v6  ;;  %v1091_v18 = vshll.u32 %v3030_v16, %v1082_v6 }
 0x239   :  { %v1094_v21 = vshll.u32 %v3031_v19, %v1082_v6  ;;  %v1097_v24 = vshll.u32 %v3032_v22, %v1082_v6  ;;  %vm1100_vm4 = vcmp.lt.s32.totalorder %v1081_v10, 1  ;;  %vm1103_vm5 = vcmp.lt.s32.totalorder %v1081_v10, 4 }
 0x23a   :  { %v1086_v15 = vshrl.u32 %v3029_v13, %v1083_v9  ;;  %v1089_v17 = vshrl.u32 %v3030_v16, %v1083_v9  ;;  %v1092_v20 = vshrl.u32 %v3031_v19, %v1083_v9  ;;  %v1095_v23 = vshrl.u32 %v3032_v22, %v1083_v9 }
 0x23b   :  { %v1098_v26 = vshrl.u32 %v3033_v25, %v1083_v9  ;;  %v1084_v36 = vshrl.u32 %v3028_v11, %v1083_v9  ;;  %vm1102_vm6 = vcmp.lt.s32.totalorder %v1081_v10, 3  ;;  %vm1101_vm7 = vcmp.lt.s32.totalorder %v1081_v10, 2 }
 0x23c   :  { %v1087_v28 = vor.u32 %v1086_v15, %v1085_v12  ;;  %v1090_v29 = vor.u32 %v1089_v17, %v1088_v14  ;;  %v1093_v30 = vor.u32 %v1092_v20, %v1091_v18  ;;  %v1096_v31 = vor.u32 %v1095_v23, %v1094_v21 }
 0x23d   :  { %v1099_v32 = vor.u32 %v1098_v26, %v1097_v24 }
 0x23e   :  { %v1105_v33 = vsel %vm1103_vm5, %v1093_v30, 2102212464  ;;  %v1108_v34 = vsel %vm1100_vm4, %v1087_v28, %v1090_v29  ;;  %v1112_v35 = vsel %vm1100_vm4, %v1090_v29, %v1093_v30  ;;  %v1109_v37 = vsel %vm1103_vm5, %v1096_v31, 920167782 }
 0x23f   :  { %v1113_v38 = vsel %vm1103_vm5, %v1099_v32, 1326507024  ;;  %v1110_v39 = vsel %vm1102_vm6, %v1093_v30, %v1109_v37  ;;  %v1104_v42 = vsel %vm1100_vm4, %v1084_v36, %v1087_v28  ;;  %v1106_v43 = vsel %vm1102_vm6, %v1090_v29, %v1105_v33 }
 0x240   :  { %v1114_v40 = vsel %vm1102_vm6, %v1096_v31, %v1113_v38  ;;  %v1111_v44 = vsel %vm1101_vm7, %v1108_v34, %v1110_v39  ;;  %v1107_v52 = vsel %vm1101_vm7, %v1104_v42, %v1106_v43  ;;  %vm1160_vm4 = vweird.f32 %v3221_v50 }
 0x241   :  { %v1115_v46 = vsel %vm1101_vm7, %v1112_v35, %v1114_v40  ;;  %v3230_v49 = vmul.u32.u64.low %v1116_v41, %v1111_v44  ;;  %v3231_v51 = vmul.u32.u64.high %v1116_v41, %v1111_v44, %v3230_v49  ;;  %v1123_v54 = vmul.u32 %v1116_v41, %v1107_v52  ;;  %v26_v40 = vld [vmem:[%s3359_s1 + $0x30] sm:$0xff] }
 0x242   :  { %v3227_v47 = vmul.u32.u64.low %v1116_v41, %v1115_v46  ;;  %v3228_v48 = vmul.u32.u64.high %v1116_v41, %v1115_v46, %v3227_v47  ;;  %v3034_v37 = vmov 1   ;;  %v3035_v38 = vmov 2  }
 0x243   :  { %v1126_v53 = vadd.s32 1, %v3231_v51  ;;  %v3036_v39 = vmov 3   ;;  %v1333_v42 = vand.u32 4294901760, %v26_v40  ;;  %v27_v47 = vld [vmem:[%s3359_s1 + $0x38] sm:$0xff] }
 0x244   :  { %vm1125_vm8 = vc.u32 %v3228_v48, %v3230_v49  ;;  %v1124_v2 = vadd.s32 %v3230_v49, %v3228_v48  ;;  %v28_v48 = vld [vmem:[%s3359_s1 + $0x40] sm:$0xff]  ;;  %v1336_v49 = vand.u32 4294901760, %v27_v47 }
 0x245   :  { %v1127_v55 = vsel %vm1125_vm8, %v1126_v53, %v3231_v51  ;;  %v3252_v46 = vsub.f32 %v26_v40, %v1333_v42  ;;  %v1339_v51 = vand.u32 4294901760, %v28_v48  ;;  %v29_v40 = vld [vmem:[%s3359_s1 + $0x48] sm:$0xff] }
 0x246   :  { %v1128_v56 = vadd.s32 %v1127_v55, %v1123_v54  ;;  %v1424_v55 = vsub.f32 %v27_v47, %v1336_v49 }
 0x247   :  { %v1418_v53 = vand.u32 4294901760, %v3252_v46  ;;  %v3264_v54 = vpack.c.bf16 %v1339_v51, %v1336_v49  ;;  %v32_v49 = vld [vmem:[%s3359_s1 + $0x60] sm:$0xff] }
 0x248   :  { %v1129_v58 = vadd.s32 536870912, %v1128_v56 }
 0x24a   :  { %v1130_v59 = vshrl.u32 %v1129_v58, 30 }
 0x24c   :  { %v1131_v60 = vshll.u32 %v1130_v59, 30  ;;  %v1154_v16 = vsub.s32 4, %v1130_v59 }
 0x24e   :  { %v1132_v45 = vsub.s32 %v1128_v56, %v1131_v60  ;;  %v1155_v19 = vsel %vm1070_vm10, %v1154_v16, %v1130_v59  ;;  %v1431_v56 = vsub.f32 %v28_v48, %v1339_v51  ;;  %v1419_v59 = vsub.f32 %v3252_v46, %v1418_v53  ;;  %v31_v48 = vld [vmem:[%s3359_s1 + $0x58] sm:$0xff] }
 0x24f   :  { %v1157_v21 = vsel %vm1069_vm11, 0, %v1155_v19  ;;  %v1825_v51 = vand.u32 4294901760, %v31_v48 }
 0x250   :  { %v1134_v61 = vsub.s32 0, %v1132_v45  ;;  %v1264_v22 = vadd.s32 3, %v1157_v21  ;;  %v1161_v23 = vand.u32 3, %v1157_v21 }
 0x252   :  { %v2310_v62 = vmin.u32 %v1134_v61, %v1132_v45  ;;  %v1265_v24 = vand.u32 3, %v1264_v22  ;;  %vm1166_vm12 = vcmp.eq.s32.totalorder %v1161_v23, 2  ;;  %vm1163_vm14 = vcmp.eq.s32.totalorder %v1161_v23, 0 }
 0x253   :  { %vm1162_vm2 = vcmp.lt.s32.totalorder %v1161_v23, 2  ;;  %v1425_v61 = vand.u32 4294901760, %v1424_v55 }
 0x254   :  { %v1136_v63 = vclz %v2310_v62  ;;  %vm1270_vm13 = vcmp.eq.s32.totalorder %v1265_v24, 2  ;;  %vm1267_vm15 = vcmp.eq.s32.totalorder %v1265_v24, 0  ;;  %vm1266_vm3 = vcmp.lt.s32.totalorder %v1265_v24, 2 }
 0x255   :  { %v1432_v62 = vand.u32 4294901760, %v1431_v56 }
 0x256   :  { %v2311_v1 = vadd.s32 4294967294, %v1136_v63 }
 0x258   :  { %vm2312_vm9 = vcmp.lt.s32.totalorder %v2311_v1, 0 }
 0x259   :  { %v1139_v57 = vsel %vm2312_vm9, 0, %v2311_v1  ;;  %v1426_v1 = vsub.f32 %v1424_v55, %v1425_v61 }
 0x25a   :  { %v1140_v3 = vsub.s32 32, %v1139_v57  ;;  %v1144_v5 = vsub.s32 4294967266, %v1139_v57  ;;  %v1141_v6 = vshll.u32 %v1132_v45, %v1139_v57  ;;  %v1420_v45 = vand.u32 4294901760, %v1419_v59 }
 0x25b   :  { %v1433_v57 = vsub.f32 %v1431_v56, %v1432_v62 }
 0x25c   :  { %v1142_v7 = vshrl.u32 %v1124_v2, %v1140_v3  ;;  %v1145_v9 = vadd.s32 127, %v1144_v5  ;;  %v1427_v2 = vand.u32 4294901760, %v1426_v1 }
 0x25d   :  { %v1434_v3 = vand.u32 4294901760, %v1433_v57 }
 0x25e   :  { %v1143_v10 = vor.u32 %v1142_v7, %v1141_v6  ;;  %v1146_v11 = vshll.u32 %v1145_v9, 23  ;;  %v2897_v7 = vpack.c.bf16 %v1431_v56, %v1424_v55  ;;  %v1913_v56 = vsub.f32 %v31_v48, %v1825_v51 }
 0x25f   :  { %v2891_v5 = vpack.c.bf16 %v1434_v3, %v1427_v2 }
 0x260   :  { %v1147_v12 = vor.u32 4788187, %v1146_v11  ;;  %v1150_v14 = vcvt.s32.f32 %v1143_v10  ;;  %v2909_v10 = vpack.c.bf16 %v1432_v62, %v1425_v61  ;;  %v1914_v61 = vand.u32 4294901760, %v1913_v56 }
 0x262   :  { %v1148_v13 = vand.u32 2147483647, %v1147_v12  ;;  %v1915_v1 = vsub.f32 %v1913_v56, %v1914_v61 }
 0x264   :  { %v1151_v15 = vmul.f32 %v1150_v14, %v1148_v13  ;;  %v1289_v14 = vld [vmem:[%s3359_s1 + $0xac] sm:$0x1]  ;;  %v1916_v3 = vand.u32 4294901760, %v1915_v1 }
 0x266   :  { %v1152_v17 = vxor.u32 2147483648, %v1151_v15 }
 0x268   :  { %v1153_v18 = vsel %vm1070_vm10, %v1152_v17, %v1151_v15  ;;  %v1275_v15 = vld [vmem:[%s3359_s1 + $0xab] sm:$0x1] }
 0x269   :  { %v1156_v20 = vsel %vm1069_vm11, %v3221_v50, %v1153_v18  ;;  %v25_v50 = vld [vmem:[%s3359_s1 + $0x28] sm:$0xff] }
 0x26a   :  { %3020 = vcosq.f32 %v1156_v20  ;;  %v1330_v41 = vand.u32 4294901760, %v25_v50  ;;  %v1301_v18 = vld [vmem:[%s3359_s1 + $0xad] sm:$0x1] }
 0x26b   :  { %3022 = vsinq.f32 %v1156_v20 }
 0x26c   :  { %v3248_v43 = vpack.c.bf16 %v1333_v42, %v1330_v41  ;;  %v3250_v44 = vsub.f32 %v25_v50, %v1330_v41  ;;  %v30_v41 = vld [vmem:[%s3359_s1 + $0x50] sm:$0xff]  ;;  %v1819_v42 = vand.u32 4294901760, %v29_v40 }
 0x26e   :  { %2883 = vmatpush3.bf16.msra.mxu0 %v3248_v43  ;;  %v1411_v52 = vand.u32 4294901760, %v3250_v44  ;;  %v2894_v6 = vpack.c.bf16 %v3252_v46, %v3250_v44  ;;  %v1899_v46 = vsub.f32 %v29_v40, %v1819_v42 }
 0x26f   :  { %2884 = vmatprep.subr.bf16.mxu0 %v3024_v0 }
 0x270   :  { %v1412_v58 = vsub.f32 %v3250_v44, %v1411_v52  ;;  %v2906_v9 = vpack.c.bf16 %v1418_v53, %v1411_v52  ;;  %v1828_v52 = vand.u32 4294901760, %v32_v49  ;;  %v1900_v53 = vand.u32 4294901760, %v1899_v46 }
 0x272   :  { %2886 = vmatpush3.bf16.msra.mxu0 %v3264_v54  ;;  %v1413_v60 = vand.u32 4294901760, %v1412_v58  ;;  %v2921_v55 = vpack.c.bf16 %v1828_v52, %v1825_v51  ;;  %v1920_v58 = vsub.f32 %v32_v49, %v1828_v52  ;;  %v1901_v59 = vsub.f32 %v1899_v46, %v1900_v53 }
 0x273   :  { %2887 = vmatprep.subr.bf16.mxu0 %v3024_v0 }
 0x274   :  { %v3021_v25 = vpop.eup %3020  ;;  %v2888_v63 = vpack.c.bf16 %v1420_v45, %v1413_v60  ;;  %v1902_v45 = vand.u32 4294901760, %v1901_v59  ;;  %v1921_v62 = vand.u32 4294901760, %v1920_v58 }
 0x275   :  { %v3023_v26 = vpop.eup %3022  ;;  %v1167_v27 = vxor.u32 2147483648, %v3021_v25 }
 0x276   :  { %v1164_v28 = vxor.u32 2147483648, %v3023_v26  ;;  %v1922_v57 = vsub.f32 %v1920_v58, %v1921_v62 }
 0x277   :  { %v1168_v29 = vsel %vm1166_vm12, %v1167_v27, %v3023_v26  ;;  %v1272_v4 = vsel %vm1270_vm13, %v1167_v27, %v3023_v26 }
 0x278   :  { %v1165_v30 = vsel %vm1163_vm14, %v3021_v25, %v1164_v28  ;;  %v1269_v31 = vsel %vm1267_vm15, %v3021_v25, %v1164_v28  ;;  %v1313_v25 = vld [vmem:[%s3359_s1 + $0xae] sm:$0x1] }
 0x279   :  { %v1169_v32 = vsel %vm1162_vm2, %v1165_v30, %v1168_v29  ;;  %v1273_v33 = vsel %vm1266_vm3, %v1269_v31, %v1272_v4 }
 0x27a   :  { %v1170_v34 = vsel %vm1160_vm4, nan, %v1169_v32  ;;  %v1274_v35 = vsel %vm1160_vm4, nan, %v1273_v33  ;;  %v34_v32 = vld [vmem:[%s3359_s1 + $0xaa] sm:$0x1] }
 0x27b   :  { %1285 = vperm.xlu1 %3012, %v1170_v34   ;;  %v1276_v36 = vsub.f32 %v1274_v35, %v1170_v34 }
 0x27d   :  { %1279 = vperm.xlu0 %3014, %v1276_v36  }
 0x27f   :  { %3013 = vset.pattern.permute.xlu1 %v3034_v37 }
 0x280   :  { %1296 = vperm.xlu1 %3013, %v1170_v34  }
 0x281   :  { %3015 = vset.pattern.permute.xlu0 %v3034_v37 }
 0x282   :  { %1291 = vperm.xlu0 %3015, %v1276_v36  }
 0x284   :  { %3016 = vset.pattern.permute.xlu1 %v3035_v38 }
 0x285   :  { %1303 = vperm.xlu1 %3016, %v1276_v36  }
 0x286   :  { %3017 = vset.pattern.permute.xlu0 %v3035_v38 }
 0x287   :  { %1308 = vperm.xlu0 %3017, %v1170_v34  }
 0x289   :  { %3018 = vset.pattern.permute.xlu1 %v3036_v39 }
 0x28a   :  { %1315 = vperm.xlu1 %3018, %v1276_v36  }
 0x28b   :  { %3019 = vset.pattern.permute.xlu0 %v3036_v39 }
 0x28e   :  { %1320 = vperm.xlu1 %3018, %v1170_v34  }
 0x2fa   :  { %v1286_v11 = vpop.permute.xlu1 %1285 }
 0x2fc   :  { %v1280_v12 = vpop.permute.xlu0 %1279 }
 0x2fd   :  { %v1282_v19 = vmul.f32 %v1280_v12, %v1275_v15 }
 0x2ff   :  { %v1297_v13 = vpop.permute.xlu1 %1296  ;;  %v1288_v24 = vadd.f32 %v1286_v11, %v1282_v19  ;;  %v2945_v11 = vpack.c.bf16 %v1921_v62, %v1914_v61 }
 0x301   :  { %v1292_v16 = vpop.permute.xlu0 %1291 }
 0x302   :  { %v1294_v17 = vmul.f32 %v1292_v16, %v1289_v14 }
 0x304   :  { %v1304_v20 = vpop.permute.xlu1 %1303  ;;  %v1299_v21 = vadd.f32 %v1297_v13, %v1294_v17 }
 0x305   :  { %v1306_v22 = vmul.f32 %v1304_v20, %v1301_v18 }
 0x306   :  { %v1309_v23 = vpop.permute.xlu0 %1308  ;;  %v1300_v27 = vmul.f32 %v1299_v21, %v1288_v24  ;;  %v33_v21 = vld [vmem:[%s3359_s1 + $0xa9] sm:$0x1] }
 0x307   :  { %v1311_v28 = vadd.f32 %v1309_v23, %v1306_v22 }
 0x309   :  { %v1316_v26 = vpop.permute.xlu1 %1315  ;;  %v1312_v30 = vmul.f32 %v1311_v28, %v1300_v27 }
 0x30a   :  { %v1318_v29 = vmul.f32 %v1316_v26, %v1313_v25 }
 0x30d   :  { %v1321_v4 = vpop.permute.xlu1 %1320 }
 0x30e   :  { %v1323_v31 = vadd.f32 %v1321_v4, %v1318_v29 }
 0x310   :  { %v1324_v33 = vmul.f32 %v1323_v31, %v1312_v30 }
 0x312   :  { %v1325_v34 = vmul.f32 %v1324_v33, %v34_v32 }
 0x314   :  { %v1327_v35 = vsel %vm36_vm0, %v1325_v34, 0 }
 0x315   :  { %v1398_v36 = vand.u32 4294901760, %v1327_v35 }
 0x317   :  { %v1399_v37 = vsub.f32 %v1327_v35, %v1398_v36 }
 0x319   :  { %v1400_v38 = vand.u32 4294901760, %v1399_v37 }
 0x31b   :  { %v1401_v39 = vsub.f32 %v1399_v37, %v1400_v38 }
 0x31d   :  { %v1402_v50 = vand.u32 4294901760, %v1401_v39 }
 0x31f   :  { %2650 = vmatmul.mubr.f32.vlgmr.msra.gmra.mrb[2].mxu0 %v1402_v50 }
 0x320   :  { %2889 = vmatpush3.bf16.msra.mxu0 %v2888_v63  ;;  %2660 = vmatprep.mubr.msk.f32.mxu0 %vm3025_vm1, %v3026_v8 }
 0x321   :  { %2890 = vmatprep.subr.bf16.mxu0 %v3024_v0 }
 0x324   :  { %2892 = vmatpush3.bf16.msra.mxu0 %v2891_v5  ;;  %v1923_v5 = vand.u32 4294901760, %v1922_v57 }
 0x325   :  { %2893 = vmatprep.subr.bf16.mxu0 %v3024_v0 }
 0x327   :  { %2661 = vmatmul.mubr.f32.vlgmr.msra.gmra.mrb[2].mxu0 %v1398_v36 }
 0x328   :  { %2895 = vmatpush3.bf16.msra.mxu0 %v2894_v6  ;;  %2671 = vmatprep.mubr.msk.f32.mxu0 %vm3025_vm1, %v3026_v8  ;;  %v2927_v6 = vpack.c.bf16 %v1923_v5, %v1916_v3 }
 0x329   :  { %2896 = vmatprep.subr.bf16.mxu0 %v3024_v0 }
 0x32c   :  { %2898 = vmatpush3.bf16.msra.mxu0 %v2897_v7 }
 0x32d   :  { %2899 = vmatprep.subr.bf16.mxu0 %v3024_v0 }
 0x32f   :  { %2672 = vmatmul.mubr.f32.vlgmr.msra.gmra.mrb[2].mxu0 %v1399_v37 }
 0x330   :  { %2901 = vmatpush3.bf16.msra.mxu0 %v3248_v43  ;;  %2682 = vmatprep.mubr.msk.f32.mxu0 %vm3025_vm1, %v3026_v8 }
 0x331   :  { %2902 = vmatprep.subr.bf16.mxu0 %v3024_v0 }
 0x334   :  { %2904 = vmatpush3.bf16.msra.mxu0 %v3264_v54 }
 0x335   :  { %2905 = vmatprep.subr.bf16.mxu0 %v3024_v0 }
 0x337   :  { %2683 = vmatmul.mubr.f32.vlgmr.msra.gmra.mrb[2].mxu0 %v1400_v38 }
 0x338   :  { %2907 = vmatpush3.bf16.msra.mxu0 %v2906_v9  ;;  %2693 = vmatprep.mubr.msk.f32.mxu0 %vm3025_vm1, %v3026_v8  ;;  %v2933_v9 = vpack.c.bf16 %v1920_v58, %v1913_v56 }
 0x339   :  { %2908 = vmatprep.subr.bf16.mxu0 %v3024_v0 }
 0x33c   :  { %2910 = vmatpush3.bf16.msra.mxu0 %v2909_v10 }
 0x33d   :  { %2911 = vmatprep.subr.bf16.mxu0 %v3024_v0 }
 0x33f   :  { %2694 = vmatmul.mubr.f32.vlgmr.msra.gmra.mrb[2].mxu0 %v1398_v36 }
 0x340   :  { %2913 = vmatpush3.bf16.msra.mxu0 %v3248_v43  ;;  %2704 = vmatprep.mubr.msk.f32.mxu0 %vm3025_vm1, %v3026_v8  ;;  %v1822_v43 = vand.u32 4294901760, %v30_v41 }
 0x341   :  { %2914 = vmatprep.subr.bf16.mxu0 %v3024_v0 }
 0x342   :  { %v3320_v44 = vpack.c.bf16 %v1822_v43, %v1819_v42  ;;  %v1906_v47 = vsub.f32 %v30_v41, %v1822_v43 }
 0x344   :  { %2916 = vmatpush3.bf16.msra.mxu0 %v3264_v54  ;;  %v1907_v54 = vand.u32 4294901760, %v1906_v47  ;;  %v2930_v7 = vpack.c.bf16 %v1906_v47, %v1899_v46 }
 0x345   :  { %2917 = vmatprep.subr.bf16.mxu0 %v3024_v0 }
 0x346   :  { %v1908_v60 = vsub.f32 %v1906_v47, %v1907_v54  ;;  %v2942_v10 = vpack.c.bf16 %v1907_v54, %v1900_v53 }
 0x347   :  { %2705 = vmatmul.mubr.f32.vlgmr.msra.gmra.mrb[2].mxu0 %v1398_v36 }
 0x348   :  { %2715 = vmatprep.mubr.msk.f32.mxu0 %vm3025_vm1, %v3026_v8  ;;  %2919 = vmatpush3.bf16.msra.mxu0 %v3320_v44  ;;  %v1909_v63 = vand.u32 4294901760, %v1908_v60 }
 0x349   :  { %2920 = vmatprep.subr.bf16.mxu0 %v3024_v0 }
 0x34a   :  { %v2924_v2 = vpack.c.bf16 %v1909_v63, %v1902_v45 }
 0x34c   :  { %2922 = vmatpush3.bf16.msra.mxu0 %v2921_v55 }
 0x34d   :  { %2923 = vmatprep.subr.bf16.mxu0 %v3024_v0 }
 0x41a   :  { %v1810_v12 = vpop.f32.mrb[2].mxu0 }
 0x41b   :  { %v1814_v13 = vmul.f32 %v1810_v12, %v1810_v12  ;;  %v2706_v14 = vpop.f32.mrb[3].mxu0 }
 0x41d   :  { %v1816_v15 = vsel %vm36_vm0, %v1814_v13, 0  ;;  %vm2303_vm0 = vcmask 253952  }
 0x41e   :  { %v1887_v16 = vand.u32 4294901760, %v1816_v15 }
 0x420   :  { %v1888_v17 = vsub.f32 %v1816_v15, %v1887_v16 }
 0x422   :  { %v1889_v18 = vand.u32 4294901760, %v1888_v17 }
 0x424   :  { %v1890_v19 = vsub.f32 %v1888_v17, %v1889_v18 }
 0x426   :  { %v1891_v20 = vand.u32 4294901760, %v1890_v19 }
 0x428   :  { %2716 = vmatmul.mubr.f32.vlgmr.msra.gmra.mrb[4].mxu0 %v1891_v20 }
 0x429   :  { %2925 = vmatpush3.bf16.msra.mxu0 %v2924_v2  ;;  %2726 = vmatprep.mubr.msk.f32.mxu0 %vm3025_vm1, %v3026_v8 }
 0x42a   :  { %2926 = vmatprep.subr.bf16.mxu0 %v3024_v0 }
 0x42d   :  { %2928 = vmatpush3.bf16.msra.mxu0 %v2927_v6 }
 0x42e   :  { %2929 = vmatprep.subr.bf16.mxu0 %v3024_v0 }
 0x430   :  { %2727 = vmatmul.mubr.f32.vlgmr.msra.gmra.mrb[4].mxu0 %v1887_v16 }
 0x431   :  { %2931 = vmatpush3.bf16.msra.mxu0 %v2930_v7  ;;  %2737 = vmatprep.mubr.msk.f32.mxu0 %vm3025_vm1, %v3026_v8 }
 0x432   :  { %2932 = vmatprep.subr.bf16.mxu0 %v3024_v0 }
 0x435   :  { %2934 = vmatpush3.bf16.msra.mxu0 %v2933_v9 }
 0x436   :  { %2935 = vmatprep.subr.bf16.mxu0 %v3024_v0 }
 0x438   :  { %2738 = vmatmul.mubr.f32.vlgmr.msra.gmra.mrb[4].mxu0 %v1888_v17 }
 0x439   :  { %2937 = vmatpush3.bf16.msra.mxu0 %v3320_v44  ;;  %2748 = vmatprep.mubr.msk.f32.mxu0 %vm3025_vm1, %v3026_v8 }
 0x43a   :  { %2938 = vmatprep.subr.bf16.mxu0 %v3024_v0 }
 0x43d   :  { %2940 = vmatpush3.bf16.msra.mxu0 %v2921_v55 }
 0x43e   :  { %2941 = vmatprep.subr.bf16.mxu0 %v3024_v0 }
 0x440   :  { %2749 = vmatmul.mubr.f32.vlgmr.msra.gmra.mrb[4].mxu0 %v1889_v18 }
 0x441   :  { %2943 = vmatpush3.bf16.msra.mxu0 %v2942_v10  ;;  %2759 = vmatprep.mubr.msk.f32.mxu0 %vm3025_vm1, %v3026_v8 }
 0x442   :  { %2944 = vmatprep.subr.bf16.mxu0 %v3024_v0 }
 0x445   :  { %2946 = vmatpush3.bf16.msra.mxu0 %v2945_v11 }
 0x446   :  { %2947 = vmatprep.subr.bf16.mxu0 %v3024_v0 }
 0x448   :  { %2760 = vmatmul.mubr.f32.vlgmr.msra.gmra.mrb[4].mxu0 %v1887_v16 }
 0x449   :  { %2949 = vmatpush3.bf16.msra.mxu0 %v3320_v44  ;;  %2770 = vmatprep.mubr.msk.f32.mxu0 %vm3025_vm1, %v3026_v8 }
 0x44a   :  { %2950 = vmatprep.subr.bf16.mxu0 %v3024_v0 }
 0x44d   :  { %2952 = vmatpush3.bf16.msra.mxu0 %v2921_v55 }
 0x450   :  { %2771 = vmatmul.mubr.f32.vlgmr.msra.gmra.mrb[4].mxu0 %v1887_v16 }
 0x523   :  { %v2299_v22 = vpop.f32.mrb[4].mxu0 }
 0x524   :  { %v2956_v23 = vadd.f32 %v2299_v22, %v33_v21  ;;  %v2772_v24 = vpop.f32.mrb[5].mxu0 }
 0x526   :  { %2304 = vst.msk [vmem:[%s3361_s2] sm:$0x1] %vm2303_vm0, %v2956_v23 }

</bundles_post_ra>
